<compile_context>
chip_gen: v5e
topology: v5e:2x2
jax: 0.10.0
libtpu: 0.0.40
codegen_flags: <defaults>
</compile_context>

<pallas_src>
import functools
import math

import jax
import jax.numpy as jnp
from jax.experimental import pallas as pl
from jax.experimental.pallas import tpu as pltpu


_TOKENS_PER_STEP = 32        # tokens gathered + written per grid step (unrolled in-kernel)
_MAX_IDS_PER_CALL = 32768    # bounds scalar-prefetch SMEM (128 KiB of int32 ids per call)
_GATHER_BUFFERS = 3          # pipeline depth for the exact-row gather DMAs
_DEFAULT_VMEM_BYTES = 64 << 20  # conservative (v7x-sized) fallback for the VMEM budget


def _vmem_capacity_bytes() -> int:
    """Best-effort per-generation VMEM capacity (v5e/v6e: 128 MiB, v7x: 64 MiB)."""
    try:
        return int(pltpu.get_tpu_info().vmem_capacity_bytes)
    except Exception:  # pragma: no cover - hardware query not available
        return _DEFAULT_VMEM_BYTES


def _resident_table_kernel(tok_ref, table_ref, out_ref, *, scale, tokens_per_step):
    """Gather rows from the VMEM-resident (V, D) table; scale+store one (T, D) block.

    tok_ref   : (n_pad,) int32 in SMEM -- scalar-prefetched token ids
    table_ref : (V, D) VMEM -- full embedding table, DMA'd once, resident across grid
    out_ref   : (T, D) output block for this step
    """
    base = pl.program_id(0) * tokens_per_step
    for j in range(tokens_per_step):
        tok = tok_ref[base + j]                         # scalar id from SMEM
        row = table_ref[pl.ds(tok, 1), :]               # (1, D) dynamic sublane slice
        # Upcast -> scale -> cast folded directly into the per-row store.
        out_ref[pl.ds(j, 1), :] = (scale * row.astype(jnp.float32)).astype(out_ref.dtype)


def _row_gather_kernel(tok_ref, *refs, scale, tokens_per_step):
    """Scale+store rows already gathered by the Element(1) data-dependent BlockSpecs.

    refs[:-1] : tokens_per_step VMEM refs, each the exact (1, D) embedding row
    refs[-1]  : (T, D) output block
    """
    del tok_ref  # the gather itself was done by the data-dependent index_maps
    emb_refs, out_ref = refs[:-1], refs[-1]
    for j in range(tokens_per_step):
        row = emb_refs[j][...]                          # (1, D)
        out_ref[pl.ds(j, 1), :] = (scale * row.astype(jnp.float32)).astype(out_ref.dtype)


def _embed_chunk(ids, table, *, scale, tokens_per_step, use_resident):
    """Embed one flattened chunk of token ids. Returns (len(ids), D)."""
    n = ids.shape[0]
    V, D = table.shape
    itemsize = jnp.dtype(table.dtype).itemsize

    n_steps = pl.cdiv(n, tokens_per_step)
    n_pad = n_steps * tokens_per_step
    if n_pad != n:
        ids = jnp.pad(ids, (0, n_pad - n))              # pad id 0 is valid; sliced off below

    out_block_bytes = 2 * tokens_per_step * D * itemsize    # double-buffered output blocks

    if use_resident:
        # Table DMA'd once and kept resident (block index constant across the grid).
        in_specs = [pl.BlockSpec((V, D), lambda i, tok: (0, 0))]
        operands = (ids, table)
        kernel = functools.partial(
            _resident_table_kernel, scale=scale, tokens_per_step=tokens_per_step)
        vmem_need = V * D * itemsize + out_block_bytes
    else:
        # Exact-row gather: Element(1) on the vocab axis -> index_map returns the row id
        # itself (element offset), so only (1, D) bytes per token move from HBM.
        def emb_spec(j):
            return pl.BlockSpec(
                (pl.Element(1), D),
                lambda i, tok, j=j: (tok[i * tokens_per_step + j], 0),
                pipeline_mode=pl.Buffered(_GATHER_BUFFERS))

        in_specs = [emb_spec(j) for j in range(tokens_per_step)]
        operands = (ids,) + (table,) * tokens_per_step
        kernel = functools.partial(
            _row_gather_kernel, scale=scale, tokens_per_step=tokens_per_step)
        vmem_need = (_GATHER_BUFFERS * tokens_per_step * D * itemsize) + out_block_bytes

    vmem_limit = int(min(_vmem_capacity_bytes(),
                         max(vmem_need + (4 << 20), 8 << 20)))

    grid_spec = pltpu.PrefetchScalarGridSpec(
        num_scalar_prefetch=1,
        grid=(n_steps,),
        in_specs=in_specs,
        out_specs=pl.BlockSpec((tokens_per_step, D), lambda i, tok: (i, 0)),
    )

    out = pl.pallas_call(
        kernel,
        out_shape=jax.ShapeDtypeStruct((n_pad, D), table.dtype),
        grid_spec=grid_spec,
        compiler_params=pltpu.CompilerParams(
            dimension_semantics=("parallel",),      # token-tile axis: 2-TC split on v7x
            vmem_limit_bytes=vmem_limit),
    )(*operands)
    return out[:n]


def token_embedding(tokens: jax.Array, embedding: jax.Array, embed_dim: int | None = None,
                    *, tokens_per_step: int = _TOKENS_PER_STEP,
                    max_ids_per_call: int = _MAX_IDS_PER_CALL,
                    force_gather: bool = False) -> jax.Array:
    """Equivalent of TokenEmbedding.forward: sqrt(embed_dim) * embedding[tokens]."""
    V, D = embedding.shape
    if embed_dim is None:
        embed_dim = D
    scale = math.sqrt(embed_dim)

    lead_shape = tokens.shape
    N = 1
    for s in lead_shape:
        N *= s

    # nn.Embedding raises on out-of-range ids; clamp so a bad id can never drive an
    # out-of-bounds DMA.  (Documented semantic divergence.)
    ids = jnp.clip(tokens.reshape(N).astype(jnp.int32), 0, V - 1)

    table_bytes = V * D * jnp.dtype(embedding.dtype).itemsize
    resident_budget = _vmem_capacity_bytes() // 3   # leave room for pipelined output blocks
    use_resident = (not force_gather) and (table_bytes <= resident_budget)

    # Chunk the flattened id stream so the scalar-prefetch SMEM footprint stays bounded
    # at production sequence lengths.
    chunks = []
    for start in range(0, N, max_ids_per_call):
        chunk = ids[start:start + max_ids_per_call]
        chunks.append(_embed_chunk(chunk, embedding, scale=scale,
                                   tokens_per_step=tokens_per_step,
                                   use_resident=use_resident))
    out_flat = chunks[0] if len(chunks) == 1 else jnp.concatenate(chunks, axis=0)
    return out_flat.reshape(*lead_shape, D)


if __name__ == "__main__":
    # Module hyper-params (small, consistent with TokenEmbedding.__init__).
    charset_size = 32   # V
    embed_dim = 32      # D
    batch = 2           # B
    seq = 8             # S

    key = jax.random.PRNGKey(0)
    k_emb, k_tok = jax.random.split(key)

    # Deterministic "nn.Embedding" weight (synthetic init, not a checkpoint).
    embedding_weight = jax.random.normal(
        k_emb, (charset_size, embed_dim), dtype=jnp.float32)
    tokens = jax.random.randint(
        k_tok, (batch, seq), minval=0, maxval=charset_size, dtype=jnp.int32)

    # Pure-JAX reference of the PyTorch forward.
    ref = math.sqrt(embed_dim) * embedding_weight[tokens]

    # 1) Resident-table fast path (the path this module's tiny charset always takes).
    out = jax.block_until_ready(token_embedding(tokens, embedding_weight, embed_dim))
    assert out.shape == (batch, seq, embed_dim)
    assert out.dtype == jnp.float32
    assert jnp.allclose(out, ref, atol=1e-5, rtol=1e-5)

    # 2) Exact-row DMA-gather path (taken when the vocab outgrows VMEM) -- force it at
    #    the same small shapes to validate it as well.
    out_gather = jax.block_until_ready(
        token_embedding(tokens, embedding_weight, embed_dim, force_gather=True))
    assert jnp.allclose(out_gather, ref, atol=1e-5, rtol=1e-5)

    print("KERNEL_OK")
</pallas_src>

<mosaic_0001>
module attributes {stable_mosaic.version = 11 : i64} {
  func.func @_resident_table_kernel(%arg0: i32, %arg1: memref<32xi32, #tpu.memory_space<smem>>, %arg2: memref<32x32xf32, #tpu.memory_space<vmem>>, %arg3: memref<32x32xf32, #tpu.memory_space<vmem>>) attributes {dimension_semantics = [#tpu.dimension_semantics<parallel>], iteration_bounds = array<i64: 1>, scalar_prefetch = 1 : i64, scratch_operands = 0 : i64, tpu.core_type = #tpu.core_type<tc>, window_params = [{pipeline_mode = #tpu.pipeline_mode<synchronous>, transform_indices = @transform_0, window_bounds = array<i64: 32, 32>}, {transform_indices = @transform_1, window_bounds = array<i64: 32, 32>}]} {
    %c32_i32 = arith.constant 32 : i32
    %0 = arith.muli %arg0, %c32_i32 : i32
    %c0_i32 = arith.constant 0 : i32
    %1 = arith.addi %0, %c0_i32 : i32
    %2 = arith.index_cast %1 : i32 to index
    %3 = memref.load %arg1[%2] : memref<32xi32, #tpu.memory_space<smem>>
    %4 = arith.index_cast %3 : i32 to index
    %c0 = arith.constant 0 : index
    %5 = vector.load %arg2[%4, %c0] : memref<32x32xf32, #tpu.memory_space<vmem>>, vector<1x32xf32>
    %cst = arith.constant 5.65685415 : f32
    %6 = vector.broadcast %cst : f32 to vector<1x32xf32>
    %7 = arith.mulf %6, %5 : vector<1x32xf32>
    %c0_0 = arith.constant 0 : index
    %c0_1 = arith.constant 0 : index
    %8 = vector.load %arg3[%c0_0, %c0_1] : memref<32x32xf32, #tpu.memory_space<vmem>>, vector<1x32xf32>
    tpu.vector_store %arg3[%c0_0, %c0_1], %7 {strides = array<i32>} : memref<32x32xf32, #tpu.memory_space<vmem>>, vector<1x32xf32>,
    %c1_i32 = arith.constant 1 : i32
    %9 = arith.addi %0, %c1_i32 : i32
    %10 = arith.index_cast %9 : i32 to index
    %11 = memref.load %arg1[%10] : memref<32xi32, #tpu.memory_space<smem>>
    %12 = arith.index_cast %11 : i32 to index
    %c0_2 = arith.constant 0 : index
    %13 = vector.load %arg2[%12, %c0_2] : memref<32x32xf32, #tpu.memory_space<vmem>>, vector<1x32xf32>
    %cst_3 = arith.constant 5.65685415 : f32
    %14 = vector.broadcast %cst_3 : f32 to vector<1x32xf32>
    %15 = arith.mulf %14, %13 : vector<1x32xf32>
    %c1 = arith.constant 1 : index
    %c0_4 = arith.constant 0 : index
    %16 = vector.load %arg3[%c1, %c0_4] : memref<32x32xf32, #tpu.memory_space<vmem>>, vector<1x32xf32>
    tpu.vector_store %arg3[%c1, %c0_4], %15 {strides = array<i32>} : memref<32x32xf32, #tpu.memory_space<vmem>>, vector<1x32xf32>,
    %c2_i32 = arith.constant 2 : i32
    %17 = arith.addi %0, %c2_i32 : i32
    %18 = arith.index_cast %17 : i32 to index
    %19 = memref.load %arg1[%18] : memref<32xi32, #tpu.memory_space<smem>>
    %20 = arith.index_cast %19 : i32 to index
    %c0_5 = arith.constant 0 : index
    %21 = vector.load %arg2[%20, %c0_5] : memref<32x32xf32, #tpu.memory_space<vmem>>, vector<1x32xf32>
    %cst_6 = arith.constant 5.65685415 : f32
    %22 = vector.broadcast %cst_6 : f32 to vector<1x32xf32>
    %23 = arith.mulf %22, %21 : vector<1x32xf32>
    %c2 = arith.constant 2 : index
    %c0_7 = arith.constant 0 : index
    %24 = vector.load %arg3[%c2, %c0_7] : memref<32x32xf32, #tpu.memory_space<vmem>>, vector<1x32xf32>
    tpu.vector_store %arg3[%c2, %c0_7], %23 {strides = array<i32>} : memref<32x32xf32, #tpu.memory_space<vmem>>, vector<1x32xf32>,
    %c3_i32 = arith.constant 3 : i32
    %25 = arith.addi %0, %c3_i32 : i32
    %26 = arith.index_cast %25 : i32 to index
    %27 = memref.load %arg1[%26] : memref<32xi32, #tpu.memory_space<smem>>
    %28 = arith.index_cast %27 : i32 to index
    %c0_8 = arith.constant 0 : index
    %29 = vector.load %arg2[%28, %c0_8] : memref<32x32xf32, #tpu.memory_space<vmem>>, vector<1x32xf32>
    %cst_9 = arith.constant 5.65685415 : f32
    %30 = vector.broadcast %cst_9 : f32 to vector<1x32xf32>
    %31 = arith.mulf %30, %29 : vector<1x32xf32>
    %c3 = arith.constant 3 : index
    %c0_10 = arith.constant 0 : index
    %32 = vector.load %arg3[%c3, %c0_10] : memref<32x32xf32, #tpu.memory_space<vmem>>, vector<1x32xf32>
    tpu.vector_store %arg3[%c3, %c0_10], %31 {strides = array<i32>} : memref<32x32xf32, #tpu.memory_space<vmem>>, vector<1x32xf32>,
    %c4_i32 = arith.constant 4 : i32
    %33 = arith.addi %0, %c4_i32 : i32
    %34 = arith.index_cast %33 : i32 to index
    %35 = memref.load %arg1[%34] : memref<32xi32, #tpu.memory_space<smem>>
    %36 = arith.index_cast %35 : i32 to index
    %c0_11 = arith.constant 0 : index
    %37 = vector.load %arg2[%36, %c0_11] : memref<32x32xf32, #tpu.memory_space<vmem>>, vector<1x32xf32>
    %cst_12 = arith.constant 5.65685415 : f32
    %38 = vector.broadcast %cst_12 : f32 to vector<1x32xf32>
    %39 = arith.mulf %38, %37 : vector<1x32xf32>
    %c4 = arith.constant 4 : index
    %c0_13 = arith.constant 0 : index
    %40 = vector.load %arg3[%c4, %c0_13] : memref<32x32xf32, #tpu.memory_space<vmem>>, vector<1x32xf32>
    tpu.vector_store %arg3[%c4, %c0_13], %39 {strides = array<i32>} : memref<32x32xf32, #tpu.memory_space<vmem>>, vector<1x32xf32>,
    %c5_i32 = arith.constant 5 : i32
    %41 = arith.addi %0, %c5_i32 : i32
    %42 = arith.index_cast %41 : i32 to index
    %43 = memref.load %arg1[%42] : memref<32xi32, #tpu.memory_space<smem>>
    %44 = arith.index_cast %43 : i32 to index
    %c0_14 = arith.constant 0 : index
    %45 = vector.load %arg2[%44, %c0_14] : memref<32x32xf32, #tpu.memory_space<vmem>>, vector<1x32xf32>
    %cst_15 = arith.constant 5.65685415 : f32
    %46 = vector.broadcast %cst_15 : f32 to vector<1x32xf32>
    %47 = arith.mulf %46, %45 : vector<1x32xf32>
    %c5 = arith.constant 5 : index
    %c0_16 = arith.constant 0 : index
    %48 = vector.load %arg3[%c5, %c0_16] : memref<32x32xf32, #tpu.memory_space<vmem>>, vector<1x32xf32>
    tpu.vector_store %arg3[%c5, %c0_16], %47 {strides = array<i32>} : memref<32x32xf32, #tpu.memory_space<vmem>>, vector<1x32xf32>,
    %c6_i32 = arith.constant 6 : i32
    %49 = arith.addi %0, %c6_i32 : i32
    %50 = arith.index_cast %49 : i32 to index
    %51 = memref.load %arg1[%50] : memref<32xi32, #tpu.memory_space<smem>>
    %52 = arith.index_cast %51 : i32 to index
    %c0_17 = arith.constant 0 : index
    %53 = vector.load %arg2[%52, %c0_17] : memref<32x32xf32, #tpu.memory_space<vmem>>, vector<1x32xf32>
    %cst_18 = arith.constant 5.65685415 : f32
    %54 = vector.broadcast %cst_18 : f32 to vector<1x32xf32>
    %55 = arith.mulf %54, %53 : vector<1x32xf32>
    %c6 = arith.constant 6 : index
    %c0_19 = arith.constant 0 : index
    %56 = vector.load %arg3[%c6, %c0_19] : memref<32x32xf32, #tpu.memory_space<vmem>>, vector<1x32xf32>
    tpu.vector_store %arg3[%c6, %c0_19], %55 {strides = array<i32>} : memref<32x32xf32, #tpu.memory_space<vmem>>, vector<1x32xf32>,
    %c7_i32 = arith.constant 7 : i32
    %57 = arith.addi %0, %c7_i32 : i32
    %58 = arith.index_cast %57 : i32 to index
    %59 = memref.load %arg1[%58] : memref<32xi32, #tpu.memory_space<smem>>
    %60 = arith.index_cast %59 : i32 to index
    %c0_20 = arith.constant 0 : index
    %61 = vector.load %arg2[%60, %c0_20] : memref<32x32xf32, #tpu.memory_space<vmem>>, vector<1x32xf32>
    %cst_21 = arith.constant 5.65685415 : f32
    %62 = vector.broadcast %cst_21 : f32 to vector<1x32xf32>
    %63 = arith.mulf %62, %61 : vector<1x32xf32>
    %c7 = arith.constant 7 : index
    %c0_22 = arith.constant 0 : index
    %64 = vector.load %arg3[%c7, %c0_22] : memref<32x32xf32, #tpu.memory_space<vmem>>, vector<1x32xf32>
    tpu.vector_store %arg3[%c7, %c0_22], %63 {strides = array<i32>} : memref<32x32xf32, #tpu.memory_space<vmem>>, vector<1x32xf32>,
    %c8_i32 = arith.constant 8 : i32
    %65 = arith.addi %0, %c8_i32 : i32
    %66 = arith.index_cast %65 : i32 to index
    %67 = memref.load %arg1[%66] : memref<32xi32, #tpu.memory_space<smem>>
    %68 = arith.index_cast %67 : i32 to index
    %c0_23 = arith.constant 0 : index
    %69 = vector.load %arg2[%68, %c0_23] : memref<32x32xf32, #tpu.memory_space<vmem>>, vector<1x32xf32>
    %cst_24 = arith.constant 5.65685415 : f32
    %70 = vector.broadcast %cst_24 : f32 to vector<1x32xf32>
    %71 = arith.mulf %70, %69 : vector<1x32xf32>
    %c8 = arith.constant 8 : index
    %c0_25 = arith.constant 0 : index
    %72 = vector.load %arg3[%c8, %c0_25] : memref<32x32xf32, #tpu.memory_space<vmem>>, vector<1x32xf32>
    tpu.vector_store %arg3[%c8, %c0_25], %71 {strides = array<i32>} : memref<32x32xf32, #tpu.memory_space<vmem>>, vector<1x32xf32>,
    %c9_i32 = arith.constant 9 : i32
    %73 = arith.addi %0, %c9_i32 : i32
    %74 = arith.index_cast %73 : i32 to index
    %75 = memref.load %arg1[%74] : memref<32xi32, #tpu.memory_space<smem>>
    %76 = arith.index_cast %75 : i32 to index
    %c0_26 = arith.constant 0 : index
    %77 = vector.load %arg2[%76, %c0_26] : memref<32x32xf32, #tpu.memory_space<vmem>>, vector<1x32xf32>
    %cst_27 = arith.constant 5.65685415 : f32
    %78 = vector.broadcast %cst_27 : f32 to vector<1x32xf32>
    %79 = arith.mulf %78, %77 : vector<1x32xf32>
    %c9 = arith.constant 9 : index
    %c0_28 = arith.constant 0 : index
    %80 = vector.load %arg3[%c9, %c0_28] : memref<32x32xf32, #tpu.memory_space<vmem>>, vector<1x32xf32>
    tpu.vector_store %arg3[%c9, %c0_28], %79 {strides = array<i32>} : memref<32x32xf32, #tpu.memory_space<vmem>>, vector<1x32xf32>,
    %c10_i32 = arith.constant 10 : i32
    %81 = arith.addi %0, %c10_i32 : i32
    %82 = arith.index_cast %81 : i32 to index
    %83 = memref.load %arg1[%82] : memref<32xi32, #tpu.memory_space<smem>>
    %84 = arith.index_cast %83 : i32 to index
    %c0_29 = arith.constant 0 : index
    %85 = vector.load %arg2[%84, %c0_29] : memref<32x32xf32, #tpu.memory_space<vmem>>, vector<1x32xf32>
    %cst_30 = arith.constant 5.65685415 : f32
    %86 = vector.broadcast %cst_30 : f32 to vector<1x32xf32>
    %87 = arith.mulf %86, %85 : vector<1x32xf32>
    %c10 = arith.constant 10 : index
    %c0_31 = arith.constant 0 : index
    %88 = vector.load %arg3[%c10, %c0_31] : memref<32x32xf32, #tpu.memory_space<vmem>>, vector<1x32xf32>
    tpu.vector_store %arg3[%c10, %c0_31], %87 {strides = array<i32>} : memref<32x32xf32, #tpu.memory_space<vmem>>, vector<1x32xf32>,
    %c11_i32 = arith.constant 11 : i32
    %89 = arith.addi %0, %c11_i32 : i32
    %90 = arith.index_cast %89 : i32 to index
    %91 = memref.load %arg1[%90] : memref<32xi32, #tpu.memory_space<smem>>
    %92 = arith.index_cast %91 : i32 to index
    %c0_32 = arith.constant 0 : index
    %93 = vector.load %arg2[%92, %c0_32] : memref<32x32xf32, #tpu.memory_space<vmem>>, vector<1x32xf32>
    %cst_33 = arith.constant 5.65685415 : f32
    %94 = vector.broadcast %cst_33 : f32 to vector<1x32xf32>
    %95 = arith.mulf %94, %93 : vector<1x32xf32>
    %c11 = arith.constant 11 : index
    %c0_34 = arith.constant 0 : index
    %96 = vector.load %arg3[%c11, %c0_34] : memref<32x32xf32, #tpu.memory_space<vmem>>, vector<1x32xf32>
    tpu.vector_store %arg3[%c11, %c0_34], %95 {strides = array<i32>} : memref<32x32xf32, #tpu.memory_space<vmem>>, vector<1x32xf32>,
    %c12_i32 = arith.constant 12 : i32
    %97 = arith.addi %0, %c12_i32 : i32
    %98 = arith.index_cast %97 : i32 to index
    %99 = memref.load %arg1[%98] : memref<32xi32, #tpu.memory_space<smem>>
    %100 = arith.index_cast %99 : i32 to index
    %c0_35 = arith.constant 0 : index
    %101 = vector.load %arg2[%100, %c0_35] : memref<32x32xf32, #tpu.memory_space<vmem>>, vector<1x32xf32>
    %cst_36 = arith.constant 5.65685415 : f32
    %102 = vector.broadcast %cst_36 : f32 to vector<1x32xf32>
    %103 = arith.mulf %102, %101 : vector<1x32xf32>
    %c12 = arith.constant 12 : index
    %c0_37 = arith.constant 0 : index
    %104 = vector.load %arg3[%c12, %c0_37] : memref<32x32xf32, #tpu.memory_space<vmem>>, vector<1x32xf32>
    tpu.vector_store %arg3[%c12, %c0_37], %103 {strides = array<i32>} : memref<32x32xf32, #tpu.memory_space<vmem>>, vector<1x32xf32>,
    %c13_i32 = arith.constant 13 : i32
    %105 = arith.addi %0, %c13_i32 : i32
    %106 = arith.index_cast %105 : i32 to index
    %107 = memref.load %arg1[%106] : memref<32xi32, #tpu.memory_space<smem>>
    %108 = arith.index_cast %107 : i32 to index
    %c0_38 = arith.constant 0 : index
    %109 = vector.load %arg2[%108, %c0_38] : memref<32x32xf32, #tpu.memory_space<vmem>>, vector<1x32xf32>
    %cst_39 = arith.constant 5.65685415 : f32
    %110 = vector.broadcast %cst_39 : f32 to vector<1x32xf32>
    %111 = arith.mulf %110, %109 : vector<1x32xf32>
    %c13 = arith.constant 13 : index
    %c0_40 = arith.constant 0 : index
    %112 = vector.load %arg3[%c13, %c0_40] : memref<32x32xf32, #tpu.memory_space<vmem>>, vector<1x32xf32>
    tpu.vector_store %arg3[%c13, %c0_40], %111 {strides = array<i32>} : memref<32x32xf32, #tpu.memory_space<vmem>>, vector<1x32xf32>,
    %c14_i32 = arith.constant 14 : i32
    %113 = arith.addi %0, %c14_i32 : i32
    %114 = arith.index_cast %113 : i32 to index
    %115 = memref.load %arg1[%114] : memref<32xi32, #tpu.memory_space<smem>>
    %116 = arith.index_cast %115 : i32 to index
    %c0_41 = arith.constant 0 : index
    %117 = vector.load %arg2[%116, %c0_41] : memref<32x32xf32, #tpu.memory_space<vmem>>, vector<1x32xf32>
    %cst_42 = arith.constant 5.65685415 : f32
    %118 = vector.broadcast %cst_42 : f32 to vector<1x32xf32>
    %119 = arith.mulf %118, %117 : vector<1x32xf32>
    %c14 = arith.constant 14 : index
    %c0_43 = arith.constant 0 : index
    %120 = vector.load %arg3[%c14, %c0_43] : memref<32x32xf32, #tpu.memory_space<vmem>>, vector<1x32xf32>
    tpu.vector_store %arg3[%c14, %c0_43], %119 {strides = array<i32>} : memref<32x32xf32, #tpu.memory_space<vmem>>, vector<1x32xf32>,
    %c15_i32 = arith.constant 15 : i32
    %121 = arith.addi %0, %c15_i32 : i32
    %122 = arith.index_cast %121 : i32 to index
    %123 = memref.load %arg1[%122] : memref<32xi32, #tpu.memory_space<smem>>
    %124 = arith.index_cast %123 : i32 to index
    %c0_44 = arith.constant 0 : index
    %125 = vector.load %arg2[%124, %c0_44] : memref<32x32xf32, #tpu.memory_space<vmem>>, vector<1x32xf32>
    %cst_45 = arith.constant 5.65685415 : f32
    %126 = vector.broadcast %cst_45 : f32 to vector<1x32xf32>
    %127 = arith.mulf %126, %125 : vector<1x32xf32>
    %c15 = arith.constant 15 : index
    %c0_46 = arith.constant 0 : index
    %128 = vector.load %arg3[%c15, %c0_46] : memref<32x32xf32, #tpu.memory_space<vmem>>, vector<1x32xf32>
    tpu.vector_store %arg3[%c15, %c0_46], %127 {strides = array<i32>} : memref<32x32xf32, #tpu.memory_space<vmem>>, vector<1x32xf32>,
    %c16_i32 = arith.constant 16 : i32
    %129 = arith.addi %0, %c16_i32 : i32
    %130 = arith.index_cast %129 : i32 to index
    %131 = memref.load %arg1[%130] : memref<32xi32, #tpu.memory_space<smem>>
    %132 = arith.index_cast %131 : i32 to index
    %c0_47 = arith.constant 0 : index
    %133 = vector.load %arg2[%132, %c0_47] : memref<32x32xf32, #tpu.memory_space<vmem>>, vector<1x32xf32>
    %cst_48 = arith.constant 5.65685415 : f32
    %134 = vector.broadcast %cst_48 : f32 to vector<1x32xf32>
    %135 = arith.mulf %134, %133 : vector<1x32xf32>
    %c16 = arith.constant 16 : index
    %c0_49 = arith.constant 0 : index
    %136 = vector.load %arg3[%c16, %c0_49] : memref<32x32xf32, #tpu.memory_space<vmem>>, vector<1x32xf32>
    tpu.vector_store %arg3[%c16, %c0_49], %135 {strides = array<i32>} : memref<32x32xf32, #tpu.memory_space<vmem>>, vector<1x32xf32>,
    %c17_i32 = arith.constant 17 : i32
    %137 = arith.addi %0, %c17_i32 : i32
    %138 = arith.index_cast %137 : i32 to index
    %139 = memref.load %arg1[%138] : memref<32xi32, #tpu.memory_space<smem>>
    %140 = arith.index_cast %139 : i32 to index
    %c0_50 = arith.constant 0 : index
    %141 = vector.load %arg2[%140, %c0_50] : memref<32x32xf32, #tpu.memory_space<vmem>>, vector<1x32xf32>
    %cst_51 = arith.constant 5.65685415 : f32
    %142 = vector.broadcast %cst_51 : f32 to vector<1x32xf32>
    %143 = arith.mulf %142, %141 : vector<1x32xf32>
    %c17 = arith.constant 17 : index
    %c0_52 = arith.constant 0 : index
    %144 = vector.load %arg3[%c17, %c0_52] : memref<32x32xf32, #tpu.memory_space<vmem>>, vector<1x32xf32>
    tpu.vector_store %arg3[%c17, %c0_52], %143 {strides = array<i32>} : memref<32x32xf32, #tpu.memory_space<vmem>>, vector<1x32xf32>,
    %c18_i32 = arith.constant 18 : i32
    %145 = arith.addi %0, %c18_i32 : i32
    %146 = arith.index_cast %145 : i32 to index
    %147 = memref.load %arg1[%146] : memref<32xi32, #tpu.memory_space<smem>>
    %148 = arith.index_cast %147 : i32 to index
    %c0_53 = arith.constant 0 : index
    %149 = vector.load %arg2[%148, %c0_53] : memref<32x32xf32, #tpu.memory_space<vmem>>, vector<1x32xf32>
    %cst_54 = arith.constant 5.65685415 : f32
    %150 = vector.broadcast %cst_54 : f32 to vector<1x32xf32>
    %151 = arith.mulf %150, %149 : vector<1x32xf32>
    %c18 = arith.constant 18 : index
    %c0_55 = arith.constant 0 : index
    %152 = vector.load %arg3[%c18, %c0_55] : memref<32x32xf32, #tpu.memory_space<vmem>>, vector<1x32xf32>
    tpu.vector_store %arg3[%c18, %c0_55], %151 {strides = array<i32>} : memref<32x32xf32, #tpu.memory_space<vmem>>, vector<1x32xf32>,
    %c19_i32 = arith.constant 19 : i32
    %153 = arith.addi %0, %c19_i32 : i32
    %154 = arith.index_cast %153 : i32 to index
    %155 = memref.load %arg1[%154] : memref<32xi32, #tpu.memory_space<smem>>
    %156 = arith.index_cast %155 : i32 to index
    %c0_56 = arith.constant 0 : index
    %157 = vector.load %arg2[%156, %c0_56] : memref<32x32xf32, #tpu.memory_space<vmem>>, vector<1x32xf32>
    %cst_57 = arith.constant 5.65685415 : f32
    %158 = vector.broadcast %cst_57 : f32 to vector<1x32xf32>
    %159 = arith.mulf %158, %157 : vector<1x32xf32>
    %c19 = arith.constant 19 : index
    %c0_58 = arith.constant 0 : index
    %160 = vector.load %arg3[%c19, %c0_58] : memref<32x32xf32, #tpu.memory_space<vmem>>, vector<1x32xf32>
    tpu.vector_store %arg3[%c19, %c0_58], %159 {strides = array<i32>} : memref<32x32xf32, #tpu.memory_space<vmem>>, vector<1x32xf32>,
    %c20_i32 = arith.constant 20 : i32
    %161 = arith.addi %0, %c20_i32 : i32
    %162 = arith.index_cast %161 : i32 to index
    %163 = memref.load %arg1[%162] : memref<32xi32, #tpu.memory_space<smem>>
    %164 = arith.index_cast %163 : i32 to index
    %c0_59 = arith.constant 0 : index
    %165 = vector.load %arg2[%164, %c0_59] : memref<32x32xf32, #tpu.memory_space<vmem>>, vector<1x32xf32>
    %cst_60 = arith.constant 5.65685415 : f32
    %166 = vector.broadcast %cst_60 : f32 to vector<1x32xf32>
    %167 = arith.mulf %166, %165 : vector<1x32xf32>
    %c20 = arith.constant 20 : index
    %c0_61 = arith.constant 0 : index
    %168 = vector.load %arg3[%c20, %c0_61] : memref<32x32xf32, #tpu.memory_space<vmem>>, vector<1x32xf32>
    tpu.vector_store %arg3[%c20, %c0_61], %167 {strides = array<i32>} : memref<32x32xf32, #tpu.memory_space<vmem>>, vector<1x32xf32>,
    %c21_i32 = arith.constant 21 : i32
    %169 = arith.addi %0, %c21_i32 : i32
    %170 = arith.index_cast %169 : i32 to index
    %171 = memref.load %arg1[%170] : memref<32xi32, #tpu.memory_space<smem>>
    %172 = arith.index_cast %171 : i32 to index
    %c0_62 = arith.constant 0 : index
    %173 = vector.load %arg2[%172, %c0_62] : memref<32x32xf32, #tpu.memory_space<vmem>>, vector<1x32xf32>
    %cst_63 = arith.constant 5.65685415 : f32
    %174 = vector.broadcast %cst_63 : f32 to vector<1x32xf32>
    %175 = arith.mulf %174, %173 : vector<1x32xf32>
    %c21 = arith.constant 21 : index
    %c0_64 = arith.constant 0 : index
    %176 = vector.load %arg3[%c21, %c0_64] : memref<32x32xf32, #tpu.memory_space<vmem>>, vector<1x32xf32>
    tpu.vector_store %arg3[%c21, %c0_64], %175 {strides = array<i32>} : memref<32x32xf32, #tpu.memory_space<vmem>>, vector<1x32xf32>,
    %c22_i32 = arith.constant 22 : i32
    %177 = arith.addi %0, %c22_i32 : i32
    %178 = arith.index_cast %177 : i32 to index
    %179 = memref.load %arg1[%178] : memref<32xi32, #tpu.memory_space<smem>>
    %180 = arith.index_cast %179 : i32 to index
    %c0_65 = arith.constant 0 : index
    %181 = vector.load %arg2[%180, %c0_65] : memref<32x32xf32, #tpu.memory_space<vmem>>, vector<1x32xf32>
    %cst_66 = arith.constant 5.65685415 : f32
    %182 = vector.broadcast %cst_66 : f32 to vector<1x32xf32>
    %183 = arith.mulf %182, %181 : vector<1x32xf32>
    %c22 = arith.constant 22 : index
    %c0_67 = arith.constant 0 : index
    %184 = vector.load %arg3[%c22, %c0_67] : memref<32x32xf32, #tpu.memory_space<vmem>>, vector<1x32xf32>
    tpu.vector_store %arg3[%c22, %c0_67], %183 {strides = array<i32>} : memref<32x32xf32, #tpu.memory_space<vmem>>, vector<1x32xf32>,
    %c23_i32 = arith.constant 23 : i32
    %185 = arith.addi %0, %c23_i32 : i32
    %186 = arith.index_cast %185 : i32 to index
    %187 = memref.load %arg1[%186] : memref<32xi32, #tpu.memory_space<smem>>
    %188 = arith.index_cast %187 : i32 to index
    %c0_68 = arith.constant 0 : index
    %189 = vector.load %arg2[%188, %c0_68] : memref<32x32xf32, #tpu.memory_space<vmem>>, vector<1x32xf32>
    %cst_69 = arith.constant 5.65685415 : f32
    %190 = vector.broadcast %cst_69 : f32 to vector<1x32xf32>
    %191 = arith.mulf %190, %189 : vector<1x32xf32>
    %c23 = arith.constant 23 : index
    %c0_70 = arith.constant 0 : index
    %192 = vector.load %arg3[%c23, %c0_70] : memref<32x32xf32, #tpu.memory_space<vmem>>, vector<1x32xf32>
    tpu.vector_store %arg3[%c23, %c0_70], %191 {strides = array<i32>} : memref<32x32xf32, #tpu.memory_space<vmem>>, vector<1x32xf32>,
    %c24_i32 = arith.constant 24 : i32
    %193 = arith.addi %0, %c24_i32 : i32
    %194 = arith.index_cast %193 : i32 to index
    %195 = memref.load %arg1[%194] : memref<32xi32, #tpu.memory_space<smem>>
    %196 = arith.index_cast %195 : i32 to index
    %c0_71 = arith.constant 0 : index
    %197 = vector.load %arg2[%196, %c0_71] : memref<32x32xf32, #tpu.memory_space<vmem>>, vector<1x32xf32>
    %cst_72 = arith.constant 5.65685415 : f32
    %198 = vector.broadcast %cst_72 : f32 to vector<1x32xf32>
    %199 = arith.mulf %198, %197 : vector<1x32xf32>
    %c24 = arith.constant 24 : index
    %c0_73 = arith.constant 0 : index
    %200 = vector.load %arg3[%c24, %c0_73] : memref<32x32xf32, #tpu.memory_space<vmem>>, vector<1x32xf32>
    tpu.vector_store %arg3[%c24, %c0_73], %199 {strides = array<i32>} : memref<32x32xf32, #tpu.memory_space<vmem>>, vector<1x32xf32>,
    %c25_i32 = arith.constant 25 : i32
    %201 = arith.addi %0, %c25_i32 : i32
    %202 = arith.index_cast %201 : i32 to index
    %203 = memref.load %arg1[%202] : memref<32xi32, #tpu.memory_space<smem>>
    %204 = arith.index_cast %203 : i32 to index
    %c0_74 = arith.constant 0 : index
    %205 = vector.load %arg2[%204, %c0_74] : memref<32x32xf32, #tpu.memory_space<vmem>>, vector<1x32xf32>
    %cst_75 = arith.constant 5.65685415 : f32
    %206 = vector.broadcast %cst_75 : f32 to vector<1x32xf32>
    %207 = arith.mulf %206, %205 : vector<1x32xf32>
    %c25 = arith.constant 25 : index
    %c0_76 = arith.constant 0 : index
    %208 = vector.load %arg3[%c25, %c0_76] : memref<32x32xf32, #tpu.memory_space<vmem>>, vector<1x32xf32>
    tpu.vector_store %arg3[%c25, %c0_76], %207 {strides = array<i32>} : memref<32x32xf32, #tpu.memory_space<vmem>>, vector<1x32xf32>,
    %c26_i32 = arith.constant 26 : i32
    %209 = arith.addi %0, %c26_i32 : i32
    %210 = arith.index_cast %209 : i32 to index
    %211 = memref.load %arg1[%210] : memref<32xi32, #tpu.memory_space<smem>>
    %212 = arith.index_cast %211 : i32 to index
    %c0_77 = arith.constant 0 : index
    %213 = vector.load %arg2[%212, %c0_77] : memref<32x32xf32, #tpu.memory_space<vmem>>, vector<1x32xf32>
    %cst_78 = arith.constant 5.65685415 : f32
    %214 = vector.broadcast %cst_78 : f32 to vector<1x32xf32>
    %215 = arith.mulf %214, %213 : vector<1x32xf32>
    %c26 = arith.constant 26 : index
    %c0_79 = arith.constant 0 : index
    %216 = vector.load %arg3[%c26, %c0_79] : memref<32x32xf32, #tpu.memory_space<vmem>>, vector<1x32xf32>
    tpu.vector_store %arg3[%c26, %c0_79], %215 {strides = array<i32>} : memref<32x32xf32, #tpu.memory_space<vmem>>, vector<1x32xf32>,
    %c27_i32 = arith.constant 27 : i32
    %217 = arith.addi %0, %c27_i32 : i32
    %218 = arith.index_cast %217 : i32 to index
    %219 = memref.load %arg1[%218] : memref<32xi32, #tpu.memory_space<smem>>
    %220 = arith.index_cast %219 : i32 to index
    %c0_80 = arith.constant 0 : index
    %221 = vector.load %arg2[%220, %c0_80] : memref<32x32xf32, #tpu.memory_space<vmem>>, vector<1x32xf32>
    %cst_81 = arith.constant 5.65685415 : f32
    %222 = vector.broadcast %cst_81 : f32 to vector<1x32xf32>
    %223 = arith.mulf %222, %221 : vector<1x32xf32>
    %c27 = arith.constant 27 : index
    %c0_82 = arith.constant 0 : index
    %224 = vector.load %arg3[%c27, %c0_82] : memref<32x32xf32, #tpu.memory_space<vmem>>, vector<1x32xf32>
    tpu.vector_store %arg3[%c27, %c0_82], %223 {strides = array<i32>} : memref<32x32xf32, #tpu.memory_space<vmem>>, vector<1x32xf32>,
    %c28_i32 = arith.constant 28 : i32
    %225 = arith.addi %0, %c28_i32 : i32
    %226 = arith.index_cast %225 : i32 to index
    %227 = memref.load %arg1[%226] : memref<32xi32, #tpu.memory_space<smem>>
    %228 = arith.index_cast %227 : i32 to index
    %c0_83 = arith.constant 0 : index
    %229 = vector.load %arg2[%228, %c0_83] : memref<32x32xf32, #tpu.memory_space<vmem>>, vector<1x32xf32>
    %cst_84 = arith.constant 5.65685415 : f32
    %230 = vector.broadcast %cst_84 : f32 to vector<1x32xf32>
    %231 = arith.mulf %230, %229 : vector<1x32xf32>
    %c28 = arith.constant 28 : index
    %c0_85 = arith.constant 0 : index
    %232 = vector.load %arg3[%c28, %c0_85] : memref<32x32xf32, #tpu.memory_space<vmem>>, vector<1x32xf32>
    tpu.vector_store %arg3[%c28, %c0_85], %231 {strides = array<i32>} : memref<32x32xf32, #tpu.memory_space<vmem>>, vector<1x32xf32>,
    %c29_i32 = arith.constant 29 : i32
    %233 = arith.addi %0, %c29_i32 : i32
    %234 = arith.index_cast %233 : i32 to index
    %235 = memref.load %arg1[%234] : memref<32xi32, #tpu.memory_space<smem>>
    %236 = arith.index_cast %235 : i32 to index
    %c0_86 = arith.constant 0 : index
    %237 = vector.load %arg2[%236, %c0_86] : memref<32x32xf32, #tpu.memory_space<vmem>>, vector<1x32xf32>
    %cst_87 = arith.constant 5.65685415 : f32
    %238 = vector.broadcast %cst_87 : f32 to vector<1x32xf32>
    %239 = arith.mulf %238, %237 : vector<1x32xf32>
    %c29 = arith.constant 29 : index
    %c0_88 = arith.constant 0 : index
    %240 = vector.load %arg3[%c29, %c0_88] : memref<32x32xf32, #tpu.memory_space<vmem>>, vector<1x32xf32>
    tpu.vector_store %arg3[%c29, %c0_88], %239 {strides = array<i32>} : memref<32x32xf32, #tpu.memory_space<vmem>>, vector<1x32xf32>,
    %c30_i32 = arith.constant 30 : i32
    %241 = arith.addi %0, %c30_i32 : i32
    %242 = arith.index_cast %241 : i32 to index
    %243 = memref.load %arg1[%242] : memref<32xi32, #tpu.memory_space<smem>>
    %244 = arith.index_cast %243 : i32 to index
    %c0_89 = arith.constant 0 : index
    %245 = vector.load %arg2[%244, %c0_89] : memref<32x32xf32, #tpu.memory_space<vmem>>, vector<1x32xf32>
    %cst_90 = arith.constant 5.65685415 : f32
    %246 = vector.broadcast %cst_90 : f32 to vector<1x32xf32>
    %247 = arith.mulf %246, %245 : vector<1x32xf32>
    %c30 = arith.constant 30 : index
    %c0_91 = arith.constant 0 : index
    %248 = vector.load %arg3[%c30, %c0_91] : memref<32x32xf32, #tpu.memory_space<vmem>>, vector<1x32xf32>
    tpu.vector_store %arg3[%c30, %c0_91], %247 {strides = array<i32>} : memref<32x32xf32, #tpu.memory_space<vmem>>, vector<1x32xf32>,
    %c31_i32 = arith.constant 31 : i32
    %249 = arith.addi %0, %c31_i32 : i32
    %250 = arith.index_cast %249 : i32 to index
    %251 = memref.load %arg1[%250] : memref<32xi32, #tpu.memory_space<smem>>
    %252 = arith.index_cast %251 : i32 to index
    %c0_92 = arith.constant 0 : index
    %253 = vector.load %arg2[%252, %c0_92] : memref<32x32xf32, #tpu.memory_space<vmem>>, vector<1x32xf32>
    %cst_93 = arith.constant 5.65685415 : f32
    %254 = vector.broadcast %cst_93 : f32 to vector<1x32xf32>
    %255 = arith.mulf %254, %253 : vector<1x32xf32>
    %c31 = arith.constant 31 : index
    %c0_94 = arith.constant 0 : index
    %256 = vector.load %arg3[%c31, %c0_94] : memref<32x32xf32, #tpu.memory_space<vmem>>, vector<1x32xf32>
    tpu.vector_store %arg3[%c31, %c0_94], %255 {strides = array<i32>} : memref<32x32xf32, #tpu.memory_space<vmem>>, vector<1x32xf32>,
    return
  }
  func.func @transform_0(%arg0: i32, %arg1: memref<32xi32, #tpu.memory_space<smem>>) -> (i32, i32) {
    %c0_i32 = arith.constant 0 : i32
    %c0_i32_0 = arith.constant 0 : i32
    %c0_i32_1 = arith.constant 0 : i32
    return %c0_i32, %c0_i32_0 : i32, i32
  }
  func.func @transform_1(%arg0: i32, %arg1: memref<32xi32, #tpu.memory_space<smem>>) -> (i32, i32) {
    %c0_i32 = arith.constant 0 : i32
    %c0_i32_0 = arith.constant 0 : i32
    return %arg0, %c0_i32 : i32, i32
  }
}

</mosaic_0001>

<bundles_post_ra>
// kernel: tpu_custom_call.1
= control target key start
LH: loop header
LB: loop body
LE: loop exit
PB: predicated region body
PF: predicated region fallthrough
CT: control target
= control target key end

     0   :  { %s380_s12 = smov [#allocation3]   ;;  %s453_s0 = inlined_call_operand.hbm [shape: s32[32], index: 0, kind: input, shape index: {}]   ;;  %s454_s1 = inlined_call_operand.hbm [shape: f32[32,32], index: 1, kind: input, shape index: {}]   ;;  %s455_s2 = inlined_call_operand.hbm [shape: f32[32,32], index: 2, kind: output, shape index: {}]  }
   0x1   :  { %s8_s11 = sshll.u32 %s453_s0, 4  ;;  %s9_s11 = int_to_ptr.hbm [resolvable:$true] %s8_s11 }
   0x2   :  { %11 = dma.hbm_to_smem %s9_s11, 16, %s380_s12, [#allocation2] }
   0x3   :  { %374 = dma.done.wait [#allocation2], 16 }
   0x4   :  { %375 = vsyncadd [#allocation2], 4294967280 }
   0x5   :  { %14 = sfence }
   0x6   :  { %15 = vsyncpa [#allocation5], 0 }
   0x7   :  { %16 = vsyncpa [#allocation6], 0  ;;  %s21_s15 = sshll.u32 %s454_s1, 4  ;;  %s381_s16 = smov [#allocation4]   ;;  %s22_s15 = int_to_ptr.hbm [resolvable:$true] %s21_s15 }
   0x8   :  { %s23_s17 = sshll.u32 %s381_s16, 4  ;;  %s382_s18 = smov 128   ;;  %s24_s17 = int_to_ptr.vmem [resolvable:$true] %s23_s17 }
   0x9   :  { %s383_s19 = smov 8  }
   0xa   :  { %29 = dma.hbm_to_vmem [thread:$0]  %s22_s15, 512, %s24_s17, [#allocation5], %s382_s18, %s382_s18, %s383_s19  }
   0xb   :  { %376 = dma.done.wait [#allocation5], 512  }
   0xc   :  { %377 = vsyncadd [#allocation5], 4294966784  ;;  %s35_s0 = sld [smem:[#allocation3]]  ;;  %vm39_vm0 = vcmask 253952  }
   0xd   :  { %s278_s20 = sld [smem:[#allocation3 + $0x1]] }
   0xe   :  { %s279_s21 = sld [smem:[#allocation3 + $0x2]] }
   0xf   :  { %s280_s22 = sld [smem:[#allocation3 + $0x3]] }
  0x10   :  { %s281_s23 = sld [smem:[#allocation3 + $0x4]] }
  0x11   :  { %s282_s24 = sld [smem:[#allocation3 + $0x5]] }
  0x12   :  { %s283_s25 = sld [smem:[#allocation3 + $0x6]]  ;;  %s36_s1 = scalar_lea.vmem [#allocation4], %s35_s0 }
  0x13   :  { %v37_v0 = vld [vmem:[%s36_s1] sm:$0x1]  ;;  %s284_s26 = sld [smem:[#allocation3 + $0x7]]  ;;  %s43_s27 = scalar_lea.vmem [#allocation4], %s278_s20 }
  0x14   :  { %v38_v1 = vmul.f32 5.656854, %v37_v0  ;;  %v44_v2 = vld [vmem:[%s43_s27] sm:$0x1]  ;;  %s49_s28 = scalar_lea.vmem [#allocation4], %s279_s21  ;;  %s285_s6 = sld [smem:[#allocation3 + $0x8]] }
  0x15   :  { %v45_v3 = vmul.f32 5.656854, %v44_v2  ;;  %v50_v4 = vld [vmem:[%s49_s28] sm:$0x1]  ;;  %s55_s29 = scalar_lea.vmem [#allocation4], %s280_s22  ;;  %s286_s7 = sld [smem:[#allocation3 + $0x9]] }
  0x16   :  { %40 = vst.msk [vmem:[#allocation7] sm:$0x1] %vm39_vm0, %v38_v1  ;;  %v51_v5 = vmul.f32 5.656854, %v50_v4  ;;  %v56_v6 = vld [vmem:[%s55_s29] sm:$0x1] }
  0x17   :  { %46 = vst.msk [vmem:[#allocation7 + $0x1] sm:$0x1] %vm39_vm0, %v45_v3  ;;  %v57_v7 = vmul.f32 5.656854, %v56_v6  ;;  %s61_s30 = scalar_lea.vmem [#allocation4], %s281_s23  ;;  %s67_s3 = scalar_lea.vmem [#allocation4], %s282_s24 }
  0x18   :  { %52 = vst.msk [vmem:[#allocation7 + $0x2] sm:$0x1] %vm39_vm0, %v51_v5  ;;  %v62_v8 = vld [vmem:[%s61_s30] sm:$0x1]  ;;  %s73_s4 = scalar_lea.vmem [#allocation4], %s283_s25  ;;  %s287_s8 = sld [smem:[#allocation3 + $0xa]] }
  0x19   :  { %v68_v9 = vld [vmem:[%s67_s3] sm:$0x1]  ;;  %58 = vst.msk [vmem:[#allocation7 + $0x3] sm:$0x1] %vm39_vm0, %v57_v7  ;;  %v63_v10 = vmul.f32 5.656854, %v62_v8 }
  0x1a   :  { %v69_v11 = vmul.f32 5.656854, %v68_v9  ;;  %v74_v12 = vld [vmem:[%s73_s4] sm:$0x1]  ;;  %s79_s5 = scalar_lea.vmem [#allocation4], %s284_s26  ;;  %s288_s9 = sld [smem:[#allocation3 + $0xb]] }
  0x1b   :  { %64 = vst.msk [vmem:[#allocation7 + $0x4] sm:$0x1] %vm39_vm0, %v63_v10  ;;  %v80_v13 = vld [vmem:[%s79_s5] sm:$0x1]  ;;  %v75_v14 = vmul.f32 5.656854, %v74_v12 }
  0x1c   :  { %70 = vst.msk [vmem:[#allocation7 + $0x5] sm:$0x1] %vm39_vm0, %v69_v11  ;;  %v81_v15 = vmul.f32 5.656854, %v80_v13  ;;  %s289_s10 = sld [smem:[#allocation3 + $0xc]]  ;;  %s85_s13 = scalar_lea.vmem [#allocation4], %s285_s6 }
  0x1d   :  { %76 = vst.msk [vmem:[#allocation7 + $0x6] sm:$0x1] %vm39_vm0, %v75_v14  ;;  %s290_s11 = sld [smem:[#allocation3 + $0xd]]  ;;  %v86_v16 = vld [vmem:[%s85_s13] sm:$0x1]  ;;  %s91_s15 = scalar_lea.vmem [#allocation4], %s286_s7 }
  0x1e   :  { %82 = vst.msk [vmem:[#allocation7 + $0x7] sm:$0x1] %vm39_vm0, %v81_v15  ;;  %s291_s12 = sld [smem:[#allocation3 + $0xe]]  ;;  %v87_v17 = vmul.f32 5.656854, %v86_v16  ;;  %s97_s16 = scalar_lea.vmem [#allocation4], %s287_s8 }
  0x1f   :  { %s292_s14 = sld [smem:[#allocation3 + $0xf]]  ;;  %v92_v18 = vld [vmem:[%s91_s15] sm:$0x1] }
  0x20   :  { %v93_v19 = vmul.f32 5.656854, %v92_v18  ;;  %v98_v20 = vld [vmem:[%s97_s16] sm:$0x1]  ;;  %88 = vst.msk [vmem:[#allocation7 + $0x8] sm:$0x1] %vm39_vm0, %v87_v17 }
  0x21   :  { %v99_v21 = vmul.f32 5.656854, %v98_v20  ;;  %s103_s17 = scalar_lea.vmem [#allocation4], %s288_s9  ;;  %s293_s23 = sld [smem:[#allocation3 + $0x10]] }
  0x22   :  { %v104_v22 = vld [vmem:[%s103_s17] sm:$0x1]  ;;  %94 = vst.msk [vmem:[#allocation7 + $0x9] sm:$0x1] %vm39_vm0, %v93_v19  ;;  %s109_s0 = scalar_lea.vmem [#allocation4], %s289_s10  ;;  %s294_s24 = sld [smem:[#allocation3 + $0x11]] }
  0x23   :  { %v105_v23 = vmul.f32 5.656854, %v104_v22  ;;  %100 = vst.msk [vmem:[#allocation7 + $0xa] sm:$0x1] %vm39_vm0, %v99_v21  ;;  %v110_v24 = vld [vmem:[%s109_s0] sm:$0x1] }
  0x24   :  { %s115_s20 = scalar_lea.vmem [#allocation4], %s290_s11  ;;  %v111_v26 = vmul.f32 5.656854, %v110_v24  ;;  %s121_s21 = scalar_lea.vmem [#allocation4], %s291_s12 }
  0x25   :  { %v116_v25 = vld [vmem:[%s115_s20] sm:$0x1]  ;;  %106 = vst.msk [vmem:[#allocation7 + $0xb] sm:$0x1] %vm39_vm0, %v105_v23  ;;  %s127_s22 = scalar_lea.vmem [#allocation4], %s292_s14  ;;  %s295_s25 = sld [smem:[#allocation3 + $0x12]] }
  0x26   :  { %v117_v27 = vmul.f32 5.656854, %v116_v25  ;;  %112 = vst.msk [vmem:[#allocation7 + $0xc] sm:$0x1] %vm39_vm0, %v111_v26  ;;  %v122_v28 = vld [vmem:[%s121_s21] sm:$0x1] }
  0x27   :  { %v128_v29 = vld [vmem:[%s127_s22] sm:$0x1]  ;;  %v123_v30 = vmul.f32 5.656854, %v122_v28  ;;  %s296_s1 = sld [smem:[#allocation3 + $0x13]]  ;;  %s133_s29 = scalar_lea.vmem [#allocation4], %s293_s23 }
  0x28   :  { %118 = vst.msk [vmem:[#allocation7 + $0xd] sm:$0x1] %vm39_vm0, %v117_v27  ;;  %v129_v31 = vmul.f32 5.656854, %v128_v29  ;;  %s297_s26 = sld [smem:[#allocation3 + $0x14]]  ;;  %s139_s3 = scalar_lea.vmem [#allocation4], %s294_s24 }
  0x29   :  { %124 = vst.msk [vmem:[#allocation7 + $0xe] sm:$0x1] %vm39_vm0, %v123_v30  ;;  %s298_s27 = sld [smem:[#allocation3 + $0x15]]  ;;  %v134_v32 = vld [vmem:[%s133_s29] sm:$0x1]  ;;  %s233_s23 = sshll.u32 %s455_s2, 4  ;;  %s234_s23 = int_to_ptr.hbm [resolvable:$true] %s233_s23 }
  0x2a   :  { %130 = vst.msk [vmem:[#allocation7 + $0xf] sm:$0x1] %vm39_vm0, %v129_v31  ;;  %s299_s28 = sld [smem:[#allocation3 + $0x16]]  ;;  %v135_v33 = vmul.f32 5.656854, %v134_v32 }
  0x2b   :  { %s300_s30 = sld [smem:[#allocation3 + $0x17]]  ;;  %v140_v34 = vld [vmem:[%s139_s3] sm:$0x1]  ;;  %s145_s4 = scalar_lea.vmem [#allocation4], %s295_s25 }
  0x2c   :  { %v141_v35 = vmul.f32 5.656854, %v140_v34  ;;  %v146_v36 = vld [vmem:[%s145_s4] sm:$0x1]  ;;  %136 = vst.msk [vmem:[#allocation7 + $0x10] sm:$0x1] %vm39_vm0, %v135_v33 }
  0x2d   :  { %v147_v37 = vmul.f32 5.656854, %v146_v36  ;;  %s151_s5 = scalar_lea.vmem [#allocation4], %s296_s1  ;;  %s301_s10 = sld [smem:[#allocation3 + $0x18]] }
  0x2e   :  { %v152_v38 = vld [vmem:[%s151_s5] sm:$0x1]  ;;  %142 = vst.msk [vmem:[#allocation7 + $0x11] sm:$0x1] %vm39_vm0, %v141_v35  ;;  %s157_s6 = scalar_lea.vmem [#allocation4], %s297_s26  ;;  %s302_s11 = sld [smem:[#allocation3 + $0x19]] }
  0x2f   :  { %v153_v39 = vmul.f32 5.656854, %v152_v38  ;;  %148 = vst.msk [vmem:[#allocation7 + $0x12] sm:$0x1] %vm39_vm0, %v147_v37  ;;  %v158_v40 = vld [vmem:[%s157_s6] sm:$0x1] }
  0x30   :  { %s163_s7 = scalar_lea.vmem [#allocation4], %s298_s27  ;;  %v159_v42 = vmul.f32 5.656854, %v158_v40  ;;  %s169_s8 = scalar_lea.vmem [#allocation4], %s299_s28 }
  0x31   :  { %v164_v41 = vld [vmem:[%s163_s7] sm:$0x1]  ;;  %154 = vst.msk [vmem:[#allocation7 + $0x13] sm:$0x1] %vm39_vm0, %v153_v39  ;;  %s175_s9 = scalar_lea.vmem [#allocation4], %s300_s30  ;;  %s303_s12 = sld [smem:[#allocation3 + $0x1a]] }
  0x32   :  { %v165_v43 = vmul.f32 5.656854, %v164_v41  ;;  %160 = vst.msk [vmem:[#allocation7 + $0x14] sm:$0x1] %vm39_vm0, %v159_v42  ;;  %v170_v44 = vld [vmem:[%s169_s8] sm:$0x1] }
  0x33   :  { %v176_v45 = vld [vmem:[%s175_s9] sm:$0x1]  ;;  %v171_v46 = vmul.f32 5.656854, %v170_v44  ;;  %s304_s13 = sld [smem:[#allocation3 + $0x1b]]  ;;  %s181_s17 = scalar_lea.vmem [#allocation4], %s301_s10 }
  0x34   :  { %166 = vst.msk [vmem:[#allocation7 + $0x15] sm:$0x1] %vm39_vm0, %v165_v43  ;;  %v177_v47 = vmul.f32 5.656854, %v176_v45  ;;  %s305_s14 = sld [smem:[#allocation3 + $0x1c]]  ;;  %s187_s20 = scalar_lea.vmem [#allocation4], %s302_s11 }
  0x35   :  { %172 = vst.msk [vmem:[#allocation7 + $0x16] sm:$0x1] %vm39_vm0, %v171_v46  ;;  %s306_s15 = sld [smem:[#allocation3 + $0x1d]]  ;;  %v182_v48 = vld [vmem:[%s181_s17] sm:$0x1]  ;;  %s384_s25 = smov [#allocation7]  }
  0x36   :  { %178 = vst.msk [vmem:[#allocation7 + $0x17] sm:$0x1] %vm39_vm0, %v177_v47  ;;  %s433_s16 = sld [smem:[#allocation3 + $0x1e]]  ;;  %v183_v49 = vmul.f32 5.656854, %v182_v48  ;;  %s438_s1 = sshll.u32 %s384_s25, 4  ;;  %s232_s1 = int_to_ptr.vmem [resolvable:$true] %s438_s1 }
  0x37   :  { %s308_s0 = sld [smem:[#allocation3 + $0x1f]]  ;;  %v188_v50 = vld [vmem:[%s187_s20] sm:$0x1]  ;;  %s193_s24 = scalar_lea.vmem [#allocation4], %s303_s12 }
  0x38   :  { %v189_v51 = vmul.f32 5.656854, %v188_v50  ;;  %v194_v52 = vld [vmem:[%s193_s24] sm:$0x1]  ;;  %184 = vst.msk [vmem:[#allocation7 + $0x18] sm:$0x1] %vm39_vm0, %v183_v49 }
  0x39   :  { %v195_v53 = vmul.f32 5.656854, %v194_v52  ;;  %s199_s26 = scalar_lea.vmem [#allocation4], %s304_s13 }
  0x3a   :  { %v200_v54 = vld [vmem:[%s199_s26] sm:$0x1]  ;;  %190 = vst.msk [vmem:[#allocation7 + $0x19] sm:$0x1] %vm39_vm0, %v189_v51  ;;  %s205_s27 = scalar_lea.vmem [#allocation4], %s305_s14 }
  0x3b   :  { %v201_v55 = vmul.f32 5.656854, %v200_v54  ;;  %196 = vst.msk [vmem:[#allocation7 + $0x1a] sm:$0x1] %vm39_vm0, %v195_v53  ;;  %v206_v56 = vld [vmem:[%s205_s27] sm:$0x1] }
  0x3c   :  { %s211_s2 = scalar_lea.vmem [#allocation4], %s306_s15  ;;  %v207_v58 = vmul.f32 5.656854, %v206_v56  ;;  %s217_s28 = scalar_lea.vmem [#allocation4], %s433_s16 }
  0x3d   :  { %v212_v57 = vld [vmem:[%s211_s2] sm:$0x1]  ;;  %202 = vst.msk [vmem:[#allocation7 + $0x1b] sm:$0x1] %vm39_vm0, %v201_v55  ;;  %s223_s29 = scalar_lea.vmem [#allocation4], %s308_s0 }
  0x3e   :  { %v213_v59 = vmul.f32 5.656854, %v212_v57  ;;  %208 = vst.msk [vmem:[#allocation7 + $0x1c] sm:$0x1] %vm39_vm0, %v207_v58  ;;  %v218_v60 = vld [vmem:[%s217_s28] sm:$0x1] }
  0x3f   :  { %v224_v61 = vld [vmem:[%s223_s29] sm:$0x1]  ;;  %v219_v62 = vmul.f32 5.656854, %v218_v60 }
  0x40   :  { %214 = vst.msk [vmem:[#allocation7 + $0x1d] sm:$0x1] %vm39_vm0, %v213_v59  ;;  %v225_v63 = vmul.f32 5.656854, %v224_v61 }
  0x41   :  { %220 = vst.msk [vmem:[#allocation7 + $0x1e] sm:$0x1] %vm39_vm0, %v219_v62 }
  0x42   :  { %226 = vst.msk [vmem:[#allocation7 + $0x1f] sm:$0x1] %vm39_vm0, %v225_v63 }
  0x43   :  { %239 = dma.vmem_to_hbm [thread:$0]  %s232_s1, 512, %s234_s23, [#allocation6], %s382_s18, %s382_s18, %s383_s19  }
  0x44   :  { %378 = dma.done.wait [#allocation6], 512  }
  0x45   :  { %379 = vsyncadd [#allocation6], 4294966784 }
  0x46   :  { %244 = vsyncpa [#allocation5], 1 }
  0x47   :  { %245 = vsyncpa [#allocation6], 1 }

</bundles_post_ra>
